<compile_context>
chip_gen: v6e
topology: v6e:2x2x1
jax: 0.10.0
libtpu: 0.0.40
codegen_flags: <defaults>
</compile_context>

<pallas_src>
import math
import jax
import jax.numpy as jnp
from jax.experimental import pallas as pl
from jax.experimental.pallas import tpu as pltpu


def _round_up(x, m):
    return ((x + m - 1) // m) * m


def _cdiv(a, b):
    return -(-a // b)


def _default_num_cores():
    # Best-effort TensorCore count per chip (v7x has 2); falls back to 1.
    try:
        kind = jax.devices()[0].device_kind.lower().replace(" ", "")
        return 2 if ("v7" in kind or "tpu7" in kind) else 1
    except Exception:
        return 1


def _plan_batch(B, tile_b=None, num_cores=None, max_tile=4096):
    """Pick (padded_B, tile, n_tiles) with tile * n_tiles == padded_B.

    Single full tile for small/medium batches; multi-tile (128-aligned lanes)
    for large batches or when >=2 TensorCores should be fed.
    """
    if num_cores is None:
        num_cores = _default_num_cores()
    B8 = _round_up(max(B, 1), 8)
    if tile_b is not None:
        n = max(1, _cdiv(B8, _round_up(max(int(tile_b), 8), 8)))
    else:
        n = max(1, _cdiv(B8, max_tile))
        # v7x: give the ("parallel",) batch axis >= num_cores steps so both
        # TensorCores get work (only when the batch is big enough to be worth it).
        if num_cores > 1 and B8 >= 512 * num_cores:
            n = max(n, num_cores)
    if num_cores > 1 and n > 1:
        n = _round_up(n, num_cores)
    if n == 1:
        return B8, B8, 1
    tile = _round_up(_cdiv(B8, n), 128)   # lane-axis tiles must be 128-aligned
    n = max(1, _cdiv(B8, tile))
    if n == 1:
        return B8, B8, 1
    return n * tile, tile, n


# ----------------------------- Pallas kernel --------------------------------

def _mish(v):
    # mish(x) = x * tanh(softplus(x)).  With e = exp(x):
    #   tanh(softplus(x)) = e*(e+2) / (e*(e+2) + 2)
    # Clamp before exp for f32 safety; for x > 20, mish(x) == x in f32.
    # Divide -> approx EUP reciprocal + one VPU Newton step (EUP is the binding
    # slot at large batch; Newton restores ~f32 accuracy).
    e = jnp.exp(jnp.minimum(v, 20.0))
    g = e * (e + 2.0)
    d = g + 2.0
    r = pl.reciprocal(d, approx=True)
    r = r * (2.0 - d * r)
    return jnp.where(v > 20.0, v, v * (g * r))


def mlp_kernel(
    x_ref, emb_ref, state_ref,                 # activations, (feat, TILE_B)
    ws1_ref, bs1_ref, ws2_ref, bs2_ref,        # state_mlp   (out, in) / (out, 1)
    wt1_ref, bt1_ref, wt2_ref, bt2_ref,        # time_mlp
    wm1_ref, bm1_ref, wm2_ref, bm2_ref, wm3_ref, bm3_ref,   # mid_layer
    o_ref,                                      # (action_dim, TILE_B)
):
    f32 = jnp.float32

    # ---- state_mlp: Linear -> Mish -> Linear      (y^T = W^T @ x^T + b)
    s = state_ref[...]
    h = _mish(jnp.dot(ws1_ref[...], s, preferred_element_type=f32) + bs1_ref[...])
    ps = jnp.dot(ws2_ref[...], h, preferred_element_type=f32) + bs2_ref[...]

    # ---- time_mlp: (sin/cos embedding precomputed) -> Linear -> Mish -> Linear
    e = emb_ref[...]
    th = _mish(jnp.dot(wt1_ref[...], e, preferred_element_type=f32) + bt1_ref[...])
    t = jnp.dot(wt2_ref[...], th, preferred_element_type=f32) + bt2_ref[...]

    # ---- mid_layer: concat([x, t, ps]) (sublane stack) -> Linear -> Mish
    #                 -> Linear -> Mish -> Linear
    cat = jnp.concatenate([x_ref[...], t, ps], axis=0)
    m1 = _mish(jnp.dot(wm1_ref[...], cat, preferred_element_type=f32) + bm1_ref[...])
    m2 = _mish(jnp.dot(wm2_ref[...], m1, preferred_element_type=f32) + bm2_ref[...])
    o_ref[...] = jnp.dot(wm3_ref[...], m2, preferred_element_type=f32) + bm3_ref[...]


# ------------------------------- Wrapper -------------------------------------

def mlp_forward(x, time, state, params, tile_b=None, num_cores=None):
    """x: (B, action_dim), time: (B,), state: (B, state_dim) -> (B, action_dim)."""
    B, action_dim = x.shape
    state_dim = state.shape[1]
    hidden_dim = params["ws1_t"].shape[0]
    t_dim = params["wt2_t"].shape[0]

    padded_B, tile, n_tiles = _plan_batch(B, tile_b, num_cores)

    # Sinusoidal embedding precomputed in the wrapper (removes 16 EUP ops/row
    # and the 1-lane-wide time block from the kernel).
    arg = time.reshape(B, 1).astype(jnp.float32) * params["freq"]      # (B, half)
    emb_t = jnp.concatenate([jnp.sin(arg), jnp.cos(arg)], axis=-1).T   # (t_dim, B)

    # Transpose to the lane-dense (features, batch) layout and pad the batch
    # (lane) axis out to the tile grid.  Padded columns never mix with real
    # columns (all ops are column-independent) and are sliced off at the end.
    x_t = x.astype(jnp.float32).T
    s_t = state.astype(jnp.float32).T
    pad = padded_B - B
    if pad:
        x_t = jnp.pad(x_t, ((0, 0), (0, pad)))
        s_t = jnp.pad(s_t, ((0, 0), (0, pad)))
        emb_t = jnp.pad(emb_t, ((0, 0), (0, pad)))

    weights = (
        params["ws1_t"], params["bs1"], params["ws2_t"], params["bs2"],
        params["wt1_t"], params["bt1"], params["wt2_t"], params["bt2"],
        params["wm1_t"], params["bm1"], params["wm2_t"], params["bm2"],
        params["wm3_t"], params["bm3"],
    )

    def act_spec(feat):
        # Batch-tiled on the lane axis; auto double-buffered by the pipeline.
        return pl.BlockSpec((feat, tile), lambda i: (0, i))

    def resident_spec(arr):
        # Same full block every grid step -> kept resident in VMEM.
        return pl.BlockSpec(arr.shape, lambda i: (0, 0))

    in_specs = (
        [act_spec(action_dim), act_spec(t_dim), act_spec(state_dim)]
        + [resident_spec(w) for w in weights]
    )

    # Advisory cost estimate for XLA scheduling around the custom call.
    mm_flops_per_row = 2 * (
        state_dim * hidden_dim + hidden_dim * hidden_dim
        + t_dim * (2 * t_dim) + (2 * t_dim) * t_dim
        + (action_dim + t_dim + hidden_dim) * hidden_dim
        + hidden_dim * hidden_dim + hidden_dim * action_dim
    )
    transcendentals = padded_B * 2 * (3 * hidden_dim + 2 * t_dim)   # exp + rcp per mish elt
    bytes_accessed = (
        (action_dim + t_dim + state_dim) * padded_B * 4
        + sum(int(w.size) * w.dtype.itemsize for w in weights)
        + action_dim * padded_B * 4
    )

    out_t = pl.pallas_call(
        mlp_kernel,
        out_shape=jax.ShapeDtypeStruct((action_dim, padded_B), jnp.float32),
        grid=(n_tiles,),
        in_specs=in_specs,
        out_specs=act_spec(action_dim),
        compiler_params=pltpu.CompilerParams(
            dimension_semantics=("parallel",)),
        cost_estimate=pl.CostEstimate(
            flops=int(padded_B * mm_flops_per_row),
            transcendentals=int(transcendentals),
            bytes_accessed=int(bytes_accessed)),
    )(x_t, emb_t, s_t, *weights)

    return out_t[:, :B].T


# -------------------------- Parameter construction ---------------------------

def make_params(key, state_dim, action_dim, hidden_dim, t_dim):
    half_dim = t_dim // 2
    keys = iter(jax.random.split(key, 8))

    def linear_t(kk, fan_in, fan_out):
        # Kernel layout: W^T with shape (out, in), bias (out, 1).
        scale = 1.0 / math.sqrt(fan_in)
        w_t = jax.random.uniform(kk, (fan_out, fan_in), jnp.float32, -scale, scale)
        b = jnp.full((fan_out, 1), 0.01, jnp.float32)
        return w_t, b

    ws1_t, bs1 = linear_t(next(keys), state_dim, hidden_dim)
    ws2_t, bs2 = linear_t(next(keys), hidden_dim, hidden_dim)
    wt1_t, bt1 = linear_t(next(keys), t_dim, 2 * t_dim)
    wt2_t, bt2 = linear_t(next(keys), 2 * t_dim, t_dim)
    wm1_t, bm1 = linear_t(next(keys), action_dim + t_dim + hidden_dim, hidden_dim)
    wm2_t, bm2 = linear_t(next(keys), hidden_dim, hidden_dim)
    wm3_t, bm3 = linear_t(next(keys), hidden_dim, action_dim)

    freq = jnp.exp(
        jnp.arange(half_dim, dtype=jnp.float32) * -(math.log(10000.0) / (half_dim - 1))
    ).reshape(1, half_dim)

    return {
        "freq": freq,
        "ws1_t": ws1_t, "bs1": bs1, "ws2_t": ws2_t, "bs2": bs2,
        "wt1_t": wt1_t, "bt1": bt1, "wt2_t": wt2_t, "bt2": bt2,
        "wm1_t": wm1_t, "bm1": bm1, "wm2_t": wm2_t, "bm2": bm2,
        "wm3_t": wm3_t, "bm3": bm3,
    }


# ------------------------------ Reference (JAX) -------------------------------

def mlp_reference(x, time, state, p):
    def mish(v):
        return v * jnp.tanh(jax.nn.softplus(v))

    h = mish(state @ p["ws1_t"].T + p["bs1"].T)
    ps = h @ p["ws2_t"].T + p["bs2"].T

    arg = time.reshape(-1, 1) * p["freq"]
    emb = jnp.concatenate([jnp.sin(arg), jnp.cos(arg)], axis=-1)
    t = mish(emb @ p["wt1_t"].T + p["bt1"].T) @ p["wt2_t"].T + p["bt2"].T

    cat = jnp.concatenate([x, t, ps], axis=1)
    m = mish(cat @ p["wm1_t"].T + p["bm1"].T)
    m = mish(m @ p["wm2_t"].T + p["bm2"].T)
    return m @ p["wm3_t"].T + p["bm3"].T


# ---------------------------------- Main --------------------------------------

if __name__ == "__main__":
    state_dim, action_dim, hidden_dim, t_dim = 16, 8, 32, 16

    root = jax.random.PRNGKey(0)
    k_x, k_t, k_s, k_p = jax.random.split(root, 4)
    params = make_params(k_p, state_dim, action_dim, hidden_dim, t_dim)

    # Case 1: small batch, single-tile path.
    B = 8
    x = jax.random.normal(k_x, (B, action_dim), jnp.float32)
    time = jax.random.uniform(k_t, (B,), jnp.float32, 0.0, 100.0)
    state = jax.random.normal(k_s, (B, state_dim), jnp.float32)

    out = jax.block_until_ready(mlp_forward(x, time, state, params))
    ref = mlp_reference(x, time, state, params)
    assert out.shape == (B, action_dim)
    assert jnp.allclose(out, ref, rtol=2e-4, atol=2e-4), "mismatch vs JAX reference (B=8)"

    # Case 2: multi-tile batch grid + lane padding (B=300 -> 3 tiles of 128 lanes).
    B2 = 300
    x2 = jax.random.normal(jax.random.PRNGKey(1), (B2, action_dim), jnp.float32)
    t2 = jax.random.uniform(jax.random.PRNGKey(2), (B2,), jnp.float32, 0.0, 100.0)
    s2 = jax.random.normal(jax.random.PRNGKey(3), (B2, state_dim), jnp.float32)

    out2 = jax.block_until_ready(mlp_forward(x2, t2, s2, params, tile_b=128))
    ref2 = mlp_reference(x2, t2, s2, params)
    assert out2.shape == (B2, action_dim)
    assert jnp.allclose(out2, ref2, rtol=2e-4, atol=2e-4), "mismatch vs JAX reference (B=300)"

    print("KERNEL_OK")
</pallas_src>

<mosaic_0001>
module attributes {stable_mosaic.version = 11 : i64} {
  func.func @mlp_kernel(%arg0: i32, %arg1: memref<8x8xf32, #tpu.memory_space<vmem>>, %arg2: memref<16x8xf32, #tpu.memory_space<vmem>>, %arg3: memref<16x8xf32, #tpu.memory_space<vmem>>, %arg4: memref<32x16xf32, #tpu.memory_space<vmem>>, %arg5: memref<32x1xf32, #tpu.memory_space<vmem>>, %arg6: memref<32x32xf32, #tpu.memory_space<vmem>>, %arg7: memref<32x1xf32, #tpu.memory_space<vmem>>, %arg8: memref<32x16xf32, #tpu.memory_space<vmem>>, %arg9: memref<32x1xf32, #tpu.memory_space<vmem>>, %arg10: memref<16x32xf32, #tpu.memory_space<vmem>>, %arg11: memref<16x1xf32, #tpu.memory_space<vmem>>, %arg12: memref<32x56xf32, #tpu.memory_space<vmem>>, %arg13: memref<32x1xf32, #tpu.memory_space<vmem>>, %arg14: memref<32x32xf32, #tpu.memory_space<vmem>>, %arg15: memref<32x1xf32, #tpu.memory_space<vmem>>, %arg16: memref<8x32xf32, #tpu.memory_space<vmem>>, %arg17: memref<8x1xf32, #tpu.memory_space<vmem>>, %arg18: memref<8x8xf32, #tpu.memory_space<vmem>>) attributes {dimension_semantics = [#tpu.dimension_semantics<parallel>], iteration_bounds = array<i64: 1>, scalar_prefetch = 0 : i64, scratch_operands = 0 : i64, tpu.core_type = #tpu.core_type<tc>, window_params = [{transform_indices = @transform_0, window_bounds = array<i64: 8, 8>}, {transform_indices = @transform_1, window_bounds = array<i64: 16, 8>}, {transform_indices = @transform_2, window_bounds = array<i64: 16, 8>}, {pipeline_mode = #tpu.pipeline_mode<synchronous>, transform_indices = @transform_3, window_bounds = array<i64: 32, 16>}, {pipeline_mode = #tpu.pipeline_mode<synchronous>, transform_indices = @transform_4, window_bounds = array<i64: 32, 1>}, {pipeline_mode = #tpu.pipeline_mode<synchronous>, transform_indices = @transform_5, window_bounds = array<i64: 32, 32>}, {pipeline_mode = #tpu.pipeline_mode<synchronous>, transform_indices = @transform_6, window_bounds = array<i64: 32, 1>}, {pipeline_mode = #tpu.pipeline_mode<synchronous>, transform_indices = @transform_7, window_bounds = array<i64: 32, 16>}, {pipeline_mode = #tpu.pipeline_mode<synchronous>, transform_indices = @transform_8, window_bounds = array<i64: 32, 1>}, {pipeline_mode = #tpu.pipeline_mode<synchronous>, transform_indices = @transform_9, window_bounds = array<i64: 16, 32>}, {pipeline_mode = #tpu.pipeline_mode<synchronous>, transform_indices = @transform_10, window_bounds = array<i64: 16, 1>}, {pipeline_mode = #tpu.pipeline_mode<synchronous>, transform_indices = @transform_11, window_bounds = array<i64: 32, 56>}, {pipeline_mode = #tpu.pipeline_mode<synchronous>, transform_indices = @transform_12, window_bounds = array<i64: 32, 1>}, {pipeline_mode = #tpu.pipeline_mode<synchronous>, transform_indices = @transform_13, window_bounds = array<i64: 32, 32>}, {pipeline_mode = #tpu.pipeline_mode<synchronous>, transform_indices = @transform_14, window_bounds = array<i64: 32, 1>}, {pipeline_mode = #tpu.pipeline_mode<synchronous>, transform_indices = @transform_15, window_bounds = array<i64: 8, 32>}, {pipeline_mode = #tpu.pipeline_mode<synchronous>, transform_indices = @transform_16, window_bounds = array<i64: 8, 1>}, {transform_indices = @transform_17, window_bounds = array<i64: 8, 8>}]} {
    %c0 = arith.constant 0 : index
    %c0_0 = arith.constant 0 : index
    %0 = vector.load %arg3[%c0, %c0_0] : memref<16x8xf32, #tpu.memory_space<vmem>>, vector<16x8xf32>
    %c0_1 = arith.constant 0 : index
    %c0_2 = arith.constant 0 : index
    %1 = vector.load %arg4[%c0_1, %c0_2] : memref<32x16xf32, #tpu.memory_space<vmem>>, vector<32x16xf32>
    %cst = arith.constant dense<0.000000e+00> : vector<32x8xf32>
    %2 = tpu.matmul %1, %0, %cst {dimension_numbers = #tpu.dot_dimension_numbers<[1], [0], [0], [1], [0, 0, 1, 1], [], []>} : vector<32x16xf32>, vector<16x8xf32>, vector<32x8xf32> -> vector<32x8xf32>
    %c0_3 = arith.constant 0 : index
    %c0_4 = arith.constant 0 : index
    %3 = vector.load %arg5[%c0_3, %c0_4] : memref<32x1xf32, #tpu.memory_space<vmem>>, vector<32x1xf32>
    %4 = vector.broadcast %3 : vector<32x1xf32> to vector<32x8xf32>
    %5 = arith.addf %2, %4 : vector<32x8xf32>
    %cst_5 = arith.constant 2.000000e+01 : f32
    %6 = vector.broadcast %cst_5 : f32 to vector<32x8xf32>
    %7 = arith.minimumf %5, %6 : vector<32x8xf32>
    %8 = math.exp %7 : vector<32x8xf32>
    %cst_6 = arith.constant 2.000000e+00 : f32
    %9 = vector.broadcast %cst_6 : f32 to vector<32x8xf32>
    %10 = arith.addf %8, %9 : vector<32x8xf32>
    %11 = arith.mulf %8, %10 : vector<32x8xf32>
    %cst_7 = arith.constant 2.000000e+00 : f32
    %12 = vector.broadcast %cst_7 : f32 to vector<32x8xf32>
    %13 = arith.addf %11, %12 : vector<32x8xf32>
    %14 = tpu.reciprocal %13 {approx = true} : vector<32x8xf32> -> vector<32x8xf32>
    %15 = arith.mulf %13, %14 : vector<32x8xf32>
    %cst_8 = arith.constant 2.000000e+00 : f32
    %16 = vector.broadcast %cst_8 : f32 to vector<32x8xf32>
    %17 = arith.subf %16, %15 : vector<32x8xf32>
    %18 = arith.mulf %14, %17 : vector<32x8xf32>
    %cst_9 = arith.constant 2.000000e+01 : f32
    %19 = vector.broadcast %cst_9 : f32 to vector<32x8xf32>
    %20 = arith.cmpf ogt, %5, %19 : vector<32x8xf32>
    %21 = arith.mulf %11, %18 : vector<32x8xf32>
    %22 = arith.mulf %5, %21 : vector<32x8xf32>
    %23 = arith.select %20, %5, %22 : vector<32x8xi1>, vector<32x8xf32>
    %c0_10 = arith.constant 0 : index
    %c0_11 = arith.constant 0 : index
    %24 = vector.load %arg6[%c0_10, %c0_11] : memref<32x32xf32, #tpu.memory_space<vmem>>, vector<32x32xf32>
    %cst_12 = arith.constant dense<0.000000e+00> : vector<32x8xf32>
    %25 = tpu.matmul %24, %23, %cst_12 {dimension_numbers = #tpu.dot_dimension_numbers<[1], [0], [0], [1], [0, 0, 1, 1], [], []>} : vector<32x32xf32>, vector<32x8xf32>, vector<32x8xf32> -> vector<32x8xf32>
    %c0_13 = arith.constant 0 : index
    %c0_14 = arith.constant 0 : index
    %26 = vector.load %arg7[%c0_13, %c0_14] : memref<32x1xf32, #tpu.memory_space<vmem>>, vector<32x1xf32>
    %27 = vector.broadcast %26 : vector<32x1xf32> to vector<32x8xf32>
    %28 = arith.addf %25, %27 : vector<32x8xf32>
    %c0_15 = arith.constant 0 : index
    %c0_16 = arith.constant 0 : index
    %29 = vector.load %arg2[%c0_15, %c0_16] : memref<16x8xf32, #tpu.memory_space<vmem>>, vector<16x8xf32>
    %c0_17 = arith.constant 0 : index
    %c0_18 = arith.constant 0 : index
    %30 = vector.load %arg8[%c0_17, %c0_18] : memref<32x16xf32, #tpu.memory_space<vmem>>, vector<32x16xf32>
    %cst_19 = arith.constant dense<0.000000e+00> : vector<32x8xf32>
    %31 = tpu.matmul %30, %29, %cst_19 {dimension_numbers = #tpu.dot_dimension_numbers<[1], [0], [0], [1], [0, 0, 1, 1], [], []>} : vector<32x16xf32>, vector<16x8xf32>, vector<32x8xf32> -> vector<32x8xf32>
    %c0_20 = arith.constant 0 : index
    %c0_21 = arith.constant 0 : index
    %32 = vector.load %arg9[%c0_20, %c0_21] : memref<32x1xf32, #tpu.memory_space<vmem>>, vector<32x1xf32>
    %33 = vector.broadcast %32 : vector<32x1xf32> to vector<32x8xf32>
    %34 = arith.addf %31, %33 : vector<32x8xf32>
    %cst_22 = arith.constant 2.000000e+01 : f32
    %35 = vector.broadcast %cst_22 : f32 to vector<32x8xf32>
    %36 = arith.minimumf %34, %35 : vector<32x8xf32>
    %37 = math.exp %36 : vector<32x8xf32>
    %cst_23 = arith.constant 2.000000e+00 : f32
    %38 = vector.broadcast %cst_23 : f32 to vector<32x8xf32>
    %39 = arith.addf %37, %38 : vector<32x8xf32>
    %40 = arith.mulf %37, %39 : vector<32x8xf32>
    %cst_24 = arith.constant 2.000000e+00 : f32
    %41 = vector.broadcast %cst_24 : f32 to vector<32x8xf32>
    %42 = arith.addf %40, %41 : vector<32x8xf32>
    %43 = tpu.reciprocal %42 {approx = true} : vector<32x8xf32> -> vector<32x8xf32>
    %44 = arith.mulf %42, %43 : vector<32x8xf32>
    %cst_25 = arith.constant 2.000000e+00 : f32
    %45 = vector.broadcast %cst_25 : f32 to vector<32x8xf32>
    %46 = arith.subf %45, %44 : vector<32x8xf32>
    %47 = arith.mulf %43, %46 : vector<32x8xf32>
    %cst_26 = arith.constant 2.000000e+01 : f32
    %48 = vector.broadcast %cst_26 : f32 to vector<32x8xf32>
    %49 = arith.cmpf ogt, %34, %48 : vector<32x8xf32>
    %50 = arith.mulf %40, %47 : vector<32x8xf32>
    %51 = arith.mulf %34, %50 : vector<32x8xf32>
    %52 = arith.select %49, %34, %51 : vector<32x8xi1>, vector<32x8xf32>
    %c0_27 = arith.constant 0 : index
    %c0_28 = arith.constant 0 : index
    %53 = vector.load %arg10[%c0_27, %c0_28] : memref<16x32xf32, #tpu.memory_space<vmem>>, vector<16x32xf32>
    %cst_29 = arith.constant dense<0.000000e+00> : vector<16x8xf32>
    %54 = tpu.matmul %53, %52, %cst_29 {dimension_numbers = #tpu.dot_dimension_numbers<[1], [0], [0], [1], [0, 0, 1, 1], [], []>} : vector<16x32xf32>, vector<32x8xf32>, vector<16x8xf32> -> vector<16x8xf32>
    %c0_30 = arith.constant 0 : index
    %c0_31 = arith.constant 0 : index
    %55 = vector.load %arg11[%c0_30, %c0_31] : memref<16x1xf32, #tpu.memory_space<vmem>>, vector<16x1xf32>
    %56 = vector.broadcast %55 : vector<16x1xf32> to vector<16x8xf32>
    %57 = arith.addf %54, %56 : vector<16x8xf32>
    %c0_32 = arith.constant 0 : index
    %c0_33 = arith.constant 0 : index
    %58 = vector.load %arg1[%c0_32, %c0_33] : memref<8x8xf32, #tpu.memory_space<vmem>>, vector<8x8xf32>
    %59 = tpu.concatenate %58, %57, %28 in 0 : vector<8x8xf32>, vector<16x8xf32>, vector<32x8xf32> -> vector<56x8xf32>
    %c0_34 = arith.constant 0 : index
    %c0_35 = arith.constant 0 : index
    %60 = vector.load %arg12[%c0_34, %c0_35] : memref<32x56xf32, #tpu.memory_space<vmem>>, vector<32x56xf32>
    %cst_36 = arith.constant dense<0.000000e+00> : vector<32x8xf32>
    %61 = tpu.matmul %60, %59, %cst_36 {dimension_numbers = #tpu.dot_dimension_numbers<[1], [0], [0], [1], [0, 0, 1, 1], [], []>} : vector<32x56xf32>, vector<56x8xf32>, vector<32x8xf32> -> vector<32x8xf32>
    %c0_37 = arith.constant 0 : index
    %c0_38 = arith.constant 0 : index
    %62 = vector.load %arg13[%c0_37, %c0_38] : memref<32x1xf32, #tpu.memory_space<vmem>>, vector<32x1xf32>
    %63 = vector.broadcast %62 : vector<32x1xf32> to vector<32x8xf32>
    %64 = arith.addf %61, %63 : vector<32x8xf32>
    %cst_39 = arith.constant 2.000000e+01 : f32
    %65 = vector.broadcast %cst_39 : f32 to vector<32x8xf32>
    %66 = arith.minimumf %64, %65 : vector<32x8xf32>
    %67 = math.exp %66 : vector<32x8xf32>
    %cst_40 = arith.constant 2.000000e+00 : f32
    %68 = vector.broadcast %cst_40 : f32 to vector<32x8xf32>
    %69 = arith.addf %67, %68 : vector<32x8xf32>
    %70 = arith.mulf %67, %69 : vector<32x8xf32>
    %cst_41 = arith.constant 2.000000e+00 : f32
    %71 = vector.broadcast %cst_41 : f32 to vector<32x8xf32>
    %72 = arith.addf %70, %71 : vector<32x8xf32>
    %73 = tpu.reciprocal %72 {approx = true} : vector<32x8xf32> -> vector<32x8xf32>
    %74 = arith.mulf %72, %73 : vector<32x8xf32>
    %cst_42 = arith.constant 2.000000e+00 : f32
    %75 = vector.broadcast %cst_42 : f32 to vector<32x8xf32>
    %76 = arith.subf %75, %74 : vector<32x8xf32>
    %77 = arith.mulf %73, %76 : vector<32x8xf32>
    %cst_43 = arith.constant 2.000000e+01 : f32
    %78 = vector.broadcast %cst_43 : f32 to vector<32x8xf32>
    %79 = arith.cmpf ogt, %64, %78 : vector<32x8xf32>
    %80 = arith.mulf %70, %77 : vector<32x8xf32>
    %81 = arith.mulf %64, %80 : vector<32x8xf32>
    %82 = arith.select %79, %64, %81 : vector<32x8xi1>, vector<32x8xf32>
    %c0_44 = arith.constant 0 : index
    %c0_45 = arith.constant 0 : index
    %83 = vector.load %arg14[%c0_44, %c0_45] : memref<32x32xf32, #tpu.memory_space<vmem>>, vector<32x32xf32>
    %cst_46 = arith.constant dense<0.000000e+00> : vector<32x8xf32>
    %84 = tpu.matmul %83, %82, %cst_46 {dimension_numbers = #tpu.dot_dimension_numbers<[1], [0], [0], [1], [0, 0, 1, 1], [], []>} : vector<32x32xf32>, vector<32x8xf32>, vector<32x8xf32> -> vector<32x8xf32>
    %c0_47 = arith.constant 0 : index
    %c0_48 = arith.constant 0 : index
    %85 = vector.load %arg15[%c0_47, %c0_48] : memref<32x1xf32, #tpu.memory_space<vmem>>, vector<32x1xf32>
    %86 = vector.broadcast %85 : vector<32x1xf32> to vector<32x8xf32>
    %87 = arith.addf %84, %86 : vector<32x8xf32>
    %cst_49 = arith.constant 2.000000e+01 : f32
    %88 = vector.broadcast %cst_49 : f32 to vector<32x8xf32>
    %89 = arith.minimumf %87, %88 : vector<32x8xf32>
    %90 = math.exp %89 : vector<32x8xf32>
    %cst_50 = arith.constant 2.000000e+00 : f32
    %91 = vector.broadcast %cst_50 : f32 to vector<32x8xf32>
    %92 = arith.addf %90, %91 : vector<32x8xf32>
    %93 = arith.mulf %90, %92 : vector<32x8xf32>
    %cst_51 = arith.constant 2.000000e+00 : f32
    %94 = vector.broadcast %cst_51 : f32 to vector<32x8xf32>
    %95 = arith.addf %93, %94 : vector<32x8xf32>
    %96 = tpu.reciprocal %95 {approx = true} : vector<32x8xf32> -> vector<32x8xf32>
    %97 = arith.mulf %95, %96 : vector<32x8xf32>
    %cst_52 = arith.constant 2.000000e+00 : f32
    %98 = vector.broadcast %cst_52 : f32 to vector<32x8xf32>
    %99 = arith.subf %98, %97 : vector<32x8xf32>
    %100 = arith.mulf %96, %99 : vector<32x8xf32>
    %cst_53 = arith.constant 2.000000e+01 : f32
    %101 = vector.broadcast %cst_53 : f32 to vector<32x8xf32>
    %102 = arith.cmpf ogt, %87, %101 : vector<32x8xf32>
    %103 = arith.mulf %93, %100 : vector<32x8xf32>
    %104 = arith.mulf %87, %103 : vector<32x8xf32>
    %105 = arith.select %102, %87, %104 : vector<32x8xi1>, vector<32x8xf32>
    %c0_54 = arith.constant 0 : index
    %c0_55 = arith.constant 0 : index
    %106 = vector.load %arg16[%c0_54, %c0_55] : memref<8x32xf32, #tpu.memory_space<vmem>>, vector<8x32xf32>
    %cst_56 = arith.constant dense<0.000000e+00> : vector<8x8xf32>
    %107 = tpu.matmul %106, %105, %cst_56 {dimension_numbers = #tpu.dot_dimension_numbers<[1], [0], [0], [1], [0, 0, 1, 1], [], []>} : vector<8x32xf32>, vector<32x8xf32>, vector<8x8xf32> -> vector<8x8xf32>
    %c0_57 = arith.constant 0 : index
    %c0_58 = arith.constant 0 : index
    %108 = vector.load %arg17[%c0_57, %c0_58] : memref<8x1xf32, #tpu.memory_space<vmem>>, vector<8x1xf32>
    %109 = vector.broadcast %108 : vector<8x1xf32> to vector<8x8xf32>
    %110 = arith.addf %107, %109 : vector<8x8xf32>
    %c0_59 = arith.constant 0 : index
    %c0_60 = arith.constant 0 : index
    %111 = vector.load %arg18[%c0_59, %c0_60] : memref<8x8xf32, #tpu.memory_space<vmem>>, vector<8x8xf32>
    tpu.vector_store %arg18[%c0_59, %c0_60], %110 {strides = array<i32>} : memref<8x8xf32, #tpu.memory_space<vmem>>, vector<8x8xf32>,
    return
  }
  func.func @transform_0(%arg0: i32) -> (i32, i32) {
    %c0_i32 = arith.constant 0 : i32
    %c0_i32_0 = arith.constant 0 : i32
    return %c0_i32, %arg0 : i32, i32
  }
  func.func @transform_1(%arg0: i32) -> (i32, i32) {
    %c0_i32 = arith.constant 0 : i32
    %c0_i32_0 = arith.constant 0 : i32
    return %c0_i32, %arg0 : i32, i32
  }
  func.func @transform_2(%arg0: i32) -> (i32, i32) {
    %c0_i32 = arith.constant 0 : i32
    %c0_i32_0 = arith.constant 0 : i32
    return %c0_i32, %arg0 : i32, i32
  }
  func.func @transform_3(%arg0: i32) -> (i32, i32) {
    %c0_i32 = arith.constant 0 : i32
    %c0_i32_0 = arith.constant 0 : i32
    %c0_i32_1 = arith.constant 0 : i32
    return %c0_i32, %c0_i32_0 : i32, i32
  }
  func.func @transform_4(%arg0: i32) -> (i32, i32) {
    %c0_i32 = arith.constant 0 : i32
    %c0_i32_0 = arith.constant 0 : i32
    %c0_i32_1 = arith.constant 0 : i32
    return %c0_i32, %c0_i32_0 : i32, i32
  }
  func.func @transform_5(%arg0: i32) -> (i32, i32) {
    %c0_i32 = arith.constant 0 : i32
    %c0_i32_0 = arith.constant 0 : i32
    %c0_i32_1 = arith.constant 0 : i32
    return %c0_i32, %c0_i32_0 : i32, i32
  }
  func.func @transform_6(%arg0: i32) -> (i32, i32) {
    %c0_i32 = arith.constant 0 : i32
    %c0_i32_0 = arith.constant 0 : i32
    %c0_i32_1 = arith.constant 0 : i32
    return %c0_i32, %c0_i32_0 : i32, i32
  }
  func.func @transform_7(%arg0: i32) -> (i32, i32) {
    %c0_i32 = arith.constant 0 : i32
    %c0_i32_0 = arith.constant 0 : i32
    %c0_i32_1 = arith.constant 0 : i32
    return %c0_i32, %c0_i32_0 : i32, i32
  }
  func.func @transform_8(%arg0: i32) -> (i32, i32) {
    %c0_i32 = arith.constant 0 : i32
    %c0_i32_0 = arith.constant 0 : i32
    %c0_i32_1 = arith.constant 0 : i32
    return %c0_i32, %c0_i32_0 : i32, i32
  }
  func.func @transform_9(%arg0: i32) -> (i32, i32) {
    %c0_i32 = arith.constant 0 : i32
    %c0_i32_0 = arith.constant 0 : i32
    %c0_i32_1 = arith.constant 0 : i32
    return %c0_i32, %c0_i32_0 : i32, i32
  }
  func.func @transform_10(%arg0: i32) -> (i32, i32) {
    %c0_i32 = arith.constant 0 : i32
    %c0_i32_0 = arith.constant 0 : i32
    %c0_i32_1 = arith.constant 0 : i32
    return %c0_i32, %c0_i32_0 : i32, i32
  }
  func.func @transform_11(%arg0: i32) -> (i32, i32) {
    %c0_i32 = arith.constant 0 : i32
    %c0_i32_0 = arith.constant 0 : i32
    %c0_i32_1 = arith.constant 0 : i32
    return %c0_i32, %c0_i32_0 : i32, i32
  }
  func.func @transform_12(%arg0: i32) -> (i32, i32) {
    %c0_i32 = arith.constant 0 : i32
    %c0_i32_0 = arith.constant 0 : i32
    %c0_i32_1 = arith.constant 0 : i32
    return %c0_i32, %c0_i32_0 : i32, i32
  }
  func.func @transform_13(%arg0: i32) -> (i32, i32) {
    %c0_i32 = arith.constant 0 : i32
    %c0_i32_0 = arith.constant 0 : i32
    %c0_i32_1 = arith.constant 0 : i32
    return %c0_i32, %c0_i32_0 : i32, i32
  }
  func.func @transform_14(%arg0: i32) -> (i32, i32) {
    %c0_i32 = arith.constant 0 : i32
    %c0_i32_0 = arith.constant 0 : i32
    %c0_i32_1 = arith.constant 0 : i32
    return %c0_i32, %c0_i32_0 : i32, i32
  }
  func.func @transform_15(%arg0: i32) -> (i32, i32) {
    %c0_i32 = arith.constant 0 : i32
    %c0_i32_0 = arith.constant 0 : i32
    %c0_i32_1 = arith.constant 0 : i32
    return %c0_i32, %c0_i32_0 : i32, i32
  }
  func.func @transform_16(%arg0: i32) -> (i32, i32) {
    %c0_i32 = arith.constant 0 : i32
    %c0_i32_0 = arith.constant 0 : i32
    %c0_i32_1 = arith.constant 0 : i32
    return %c0_i32, %c0_i32_0 : i32, i32
  }
  func.func @transform_17(%arg0: i32) -> (i32, i32) {
    %c0_i32 = arith.constant 0 : i32
    %c0_i32_0 = arith.constant 0 : i32
    return %c0_i32, %arg0 : i32, i32
  }
}

</mosaic_0001>

<bundles_post_ra>
// kernel: tpu_custom_call.1
= control target key start
LH: loop header
LB: loop body
LE: loop exit
PB: predicated region body
PF: predicated region fallthrough
CT: control target
= control target key end

     0   :  { %s1722_s0 = inlined_call_operand.vmem [shape: f32[8,8], index: 0, kind: input, shape index: {}]   ;;  %s1723_s1 = inlined_call_operand.vmem [shape: f32[16,8], index: 1, kind: input, shape index: {}]   ;;  %s1724_s2 = inlined_call_operand.vmem [shape: f32[16,8], index: 2, kind: input, shape index: {}]   ;;  %s1725_s3 = inlined_call_operand.vmem [shape: f32[32,16], index: 3, kind: input, shape index: {}]   ;;  %s1726_s4 = inlined_call_operand.vmem [shape: f32[32,1], index: 4, kind: input, shape index: {}]   ;;  %s1727_s5 = inlined_call_operand.vmem [shape: f32[32,32], index: 5, kind: input, shape index: {}]   ;;  %s1728_s6 = inlined_call_operand.vmem [shape: f32[32,1], index: 6, kind: input, shape index: {}]   ;;  %s1729_s7 = inlined_call_operand.vmem [shape: f32[32,16], index: 7, kind: input, shape index: {}]   ;;  %s1730_s8 = inlined_call_operand.vmem [shape: f32[32,1], index: 8, kind: input, shape index: {}]   ;;  %s1731_s9 = inlined_call_operand.vmem [shape: f32[16,32], index: 9, kind: input, shape index: {}]   ;;  %s1732_s10 = inlined_call_operand.vmem [shape: f32[16,1], index: 10, kind: input, shape index: {}]   ;;  %s1733_s11 = inlined_call_operand.vmem [shape: f32[32,56], index: 11, kind: input, shape index: {}]   ;;  %s1734_s12 = inlined_call_operand.vmem [shape: f32[32,1], index: 12, kind: input, shape index: {}]   ;;  %s1735_s13 = inlined_call_operand.vmem [shape: f32[32,32], index: 13, kind: input, shape index: {}]   ;;  %s1736_s14 = inlined_call_operand.vmem [shape: f32[32,1], index: 14, kind: input, shape index: {}]   ;;  %s1737_s15 = inlined_call_operand.vmem [shape: f32[8,32], index: 15, kind: input, shape index: {}]   ;;  %s1738_s16 = inlined_call_operand.vmem [shape: f32[8,1], index: 16, kind: input, shape index: {}]   ;;  %s1739_s17 = inlined_call_operand.hbm [shape: f32[8,8], index: 17, kind: output, shape index: {}]  }
   0x1   :  { %1741 = sst [smem:[#allocation5_spill]] %s1722_s0 }
   0x2   :  { %1742 = sst [smem:[#allocation6_spill]] %s1723_s1 }
   0x3   :  { %v58_v0 = vld [vmem:[%s1724_s2 + $0x8] sm:$0xff]  ;;  %v57_v1 = vld [vmem:[%s1724_s2] sm:$0xff]  ;;  %vm87_vm0 = vcmask 130048   ;;  %s1743_s1 = sld [smem:[#allocation6_spill]]  ;;  %v1360_v5 = vmov 0   ;;  %v61_v6 = vld [vmem:[%s1725_s3 + $0x10] sm:$0xff] }
   0x4   :  { %v59_v2 = vld [vmem:[%s1725_s3] sm:$0xff]  ;;  %1178 = vmatprep.subr.mxu0 %v58_v0  ;;  %v60_v3 = vld [vmem:[%s1725_s3 + $0x8] sm:$0xff]  ;;  %1272 = vset.pattern.permute.xlu0 %v1360_v5  ;;  %v66_v8 = vld [vmem:[%s1726_s4 + $0x18] sm:$0xff] }
   0x5   :  { %1182 = vmatprep.mubr.msk.f32.mxu0 %vm87_vm0, %v59_v2  ;;  %1179 = vmatpush3.msra.mxu0 %v58_v0  ;;  %v64_v9 = vld [vmem:[%s1726_s4 + $0x8] sm:$0xff]  ;;  %v62_v10 = vld [vmem:[%s1725_s3 + $0x18] sm:$0xff]  ;;  %v369_v11 = vld [vmem:[%s1729_s7] sm:$0xff] }
   0x6   :  { %1180 = vmatprep.subr.mxu0 %v57_v1  ;;  %1273 = vset.pattern.permute.xlu1 %v1360_v5  ;;  %v65_v12 = vld [vmem:[%s1726_s4 + $0x10] sm:$0xff]  ;;  %v63_v13 = vld [vmem:[%s1726_s4] sm:$0xff]  ;;  %v370_v14 = vld [vmem:[%s1729_s7 + $0x8] sm:$0xff] }
   0x7   :  { %1181 = vmatpush3.msra.mxu0 %v57_v1  ;;  %84 = vperm.xlu0 %1272, %v66_v8   ;;  %v371_v15 = vld [vmem:[%s1729_s7 + $0x10] sm:$0xff] }
   0x8   :  { %1183 = vmatmul.mubr.msk.f32.vlgmr.msra.gmra.mxu0 %vm87_vm0, %v60_v3  ;;  %74 = vperm.xlu1 %1273, %v64_v9  }
   0x9   :  { %v368_v4 = vld [vmem:[%s1743_s1 + $0x8] sm:$0xff]  ;;  %v367_v7 = vld [vmem:[%s1743_s1] sm:$0xff]  ;;  %1185 = vmatprep.mubr.msk.f32.mxu0 %vm87_vm0, %v61_v6 }
   0xa   :  { %1202 = vmatprep.subr.mxu0 %v368_v4 }
   0xb   :  { %1203 = vmatpush3.msra.mxu0 %v368_v4  ;;  %79 = vperm.xlu0 %1272, %v65_v12  }
   0xc   :  { %1204 = vmatprep.subr.mxu0 %v367_v7  ;;  %1186 = vmatmul.mubr.msk.f32.gmra.mxu0 %vm87_vm0, %v62_v10 }
   0xd   :  { %1205 = vmatpush3.msra.mxu0 %v367_v7  ;;  %1206 = vmatprep.mubr.msk.f32.mxu0 %vm87_vm0, %v369_v11 }
   0xe   :  { %22 = vsyncpa [#allocation3], 0  ;;  %v376_v16 = vld [vmem:[%s1730_s8 + $0x18] sm:$0xff]  ;;  %69 = vperm.xlu1 %1273, %v63_v13   ;;  %v375_v17 = vld [vmem:[%s1730_s8 + $0x10] sm:$0xff]  ;;  %vm269_vm1 = vcmask 261120   ;;  %vm674_vm10 = vcmask 457728  }
   0xf   :  { %v372_v18 = vld [vmem:[%s1729_s7 + $0x18] sm:$0xff]  ;;  %394 = vperm.xlu0 %1272, %v376_v16   ;;  %v374_v19 = vld [vmem:[%s1730_s8 + $0x8] sm:$0xff]  ;;  %v373_v20 = vld [vmem:[%s1730_s8] sm:$0xff]  ;;  %s1744_s29 = sld [smem:[#allocation5_spill]]  ;;  %vm1362_vm15 = vmmov 0   ;;  %s1363_s21 = smov [#allocation2]  }
  0x10   :  { %1207 = vmatmul.mubr.msk.f32.vlgmr.msra.gmra.mxu0 %vm87_vm0, %v370_v14  ;;  %v248_v21 = vld [vmem:[%s1728_s6 + $0x18] sm:$0xff]  ;;  %v247_v22 = vld [vmem:[%s1728_s6 + $0x10] sm:$0xff]  ;;  %v246_v23 = vld [vmem:[%s1728_s6 + $0x8] sm:$0xff]  ;;  %s1097_s22 = sshll.u32 %s1363_s21, 4  ;;  %s1098_s22 = int_to_ptr.vmem [resolvable:$true] %s1097_s22 }
  0x11   :  { %1209 = vmatprep.mubr.msk.f32.mxu0 %vm87_vm0, %v371_v15  ;;  %v245_v24 = vld [vmem:[%s1728_s6] sm:$0xff]  ;;  %v553_v25 = vld [vmem:[%s1732_s10 + $0x8] sm:$0xff]  ;;  %v653_v27 = vld [vmem:[%s1734_s12 + $0x18] sm:$0xff]  ;;  %s1338_s23 = scalar_lea.vmem %s1098_s22, 128  ;;  %p1343_p1 = scmp.lt.s32.totalorder %s1098_s22, %s1098_s22 }
  0x12   :  { %389 = vperm.xlu1 %1273, %v375_v17   ;;  %v552_v26 = vld [vmem:[%s1732_s10] sm:$0xff]  ;;  %v652_v28 = vld [vmem:[%s1734_s12 + $0x10] sm:$0xff]  ;;  %v651_v29 = vld [vmem:[%s1734_s12 + $0x8] sm:$0xff]  ;;  %p1339_p0 = scmp.ne.s32.totalorder %s1098_s22, %s1338_s23  ;;  %p1344_p2 = scmp.lt.s32.totalorder %s1338_s23, %s1338_s23 }
  0x13   :  { %384 = vperm.xlu0 %1272, %v374_v19   ;;  %v650_v30 = vld [vmem:[%s1734_s12] sm:$0xff]  ;;  %v835_v31 = vld [vmem:[%s1736_s14 + $0x18] sm:$0xff]  ;;  %v834_v32 = vld [vmem:[%s1736_s14 + $0x10] sm:$0xff] }
  0x14   :  { %1210 = vmatmul.mubr.msk.f32.gmra.mxu0 %vm87_vm0, %v372_v18  ;;  %v833_v33 = vld [vmem:[%s1736_s14 + $0x8] sm:$0xff]  ;;  %v832_v34 = vld [vmem:[%s1736_s14] sm:$0xff]  ;;  %p1345_p3 = por %p1344_p2, %p1343_p1 }
  0x15   :  { %v1010_v35 = vld [vmem:[%s1738_s16] sm:$0xff] }
  0x16   :  { %379 = vperm.xlu1 %1273, %v373_v20   ;;  %v241_v36 = vld [vmem:[%s1727_s5] sm:$0xff]  ;;  %p1346_p4 = pnand %p1345_p3, %p1339_p0 }
  0x17   :  { %266 = vperm.xlu0 %1272, %v248_v21   ;;  %1196 = vmatprep.mubr.msk.f32.mxu1 %vm269_vm1, %v241_v36 }
  0x1a   :  { %261 = vperm.xlu1 %1273, %v247_v22  }
  0x1b   :  { %256 = vperm.xlu0 %1272, %v246_v23  }
  0x1e   :  { %251 = vperm.xlu1 %1273, %v245_v24  }
  0x1f   :  { %561 = vperm.xlu0 %1272, %v553_v25  }
  0x22   :  { %556 = vperm.xlu1 %1273, %v552_v26  }
  0x23   :  { %671 = vperm.xlu0 %1272, %v653_v27  }
  0x26   :  { %666 = vperm.xlu1 %1273, %v652_v28  }
  0x27   :  { %661 = vperm.xlu0 %1272, %v651_v29  }
  0x2a   :  { %656 = vperm.xlu1 %1273, %v650_v30  }
  0x2b   :  { %853 = vperm.xlu0 %1272, %v835_v31  }
  0x2e   :  { %848 = vperm.xlu1 %1273, %v834_v32  }
  0x2f   :  { %843 = vperm.xlu0 %1272, %v833_v33  }
  0x32   :  { %838 = vperm.xlu1 %1273, %v832_v34  }
  0x33   :  { %1013 = vperm.xlu0 %1272, %v1010_v35  }
  0x82   :  { %v85_v37 = vpop.permute.xlu0 %84 }
  0x83   :  { %v75_v38 = vpop.permute.xlu1 %74 }
  0x86   :  { %v80_v39 = vpop.permute.xlu0 %79 }
  0x89   :  { %v70_v40 = vpop.permute.xlu1 %69 }
  0x8a   :  { %v395_v43 = vpop.permute.xlu0 %394 }
  0x8d   :  { %v390_v47 = vpop.permute.xlu1 %389 }
  0x8e   :  { %v385_v56 = vpop.permute.xlu0 %384 }
  0x91   :  { %v380_v61 = vpop.permute.xlu1 %379 }
  0xc8   :  { %v1184_v41 = vpop.f32.mrf.mxu0 }
  0xc9   :  { %v1571_v42 = vadd.f32 %v1184_v41, %v75_v38 }
  0xca   :  { %v166_v44 = vpop.f32.mrf.mxu0 }
  0xcb   :  { %v186_v45 = vmin.f32 %v1571_v42, 20.0  ;;  %v1574_v46 = vadd.f32 %v166_v44, %v70_v40  ;;  %vm226_vm4 = vcmp.gt.f32.partialorder %v1571_v42, 20.0 }
  0xcc   :  { %v1187_v48 = vpop.f32.mrf.mxu0 }
  0xcd   :  { %v191_v49 = vmul.f32 1.442695, %v186_v45  ;;  %v185_v50 = vmin.f32 %v1574_v46, 20.0  ;;  %v1577_v51 = vadd.f32 %v1187_v48, %v85_v37  ;;  %vm225_vm5 = vcmp.gt.f32.partialorder %v1574_v46, 20.0 }
  0xce   :  { %v176_v52 = vpop.f32.mrf.mxu0 }
  0xcf   :  { %1274 = vpow2.f32 %v191_v49  ;;  %v189_v53 = vmul.f32 1.442695, %v185_v50  ;;  %v188_v54 = vmin.f32 %v1577_v51, 20.0  ;;  %v1580_v55 = vadd.f32 %v176_v52, %v80_v39 }
  0xd0   :  { %v1208_v57 = vpop.f32.mrf.mxu0  ;;  %vm228_vm2 = vcmp.gt.f32.partialorder %v1577_v51, 20.0 }
  0xd1   :  { %1276 = vpow2.f32 %v189_v53  ;;  %v195_v58 = vmul.f32 1.442695, %v188_v54  ;;  %v187_v59 = vmin.f32 %v1580_v55, 20.0  ;;  %v1583_v60 = vadd.f32 %v1208_v57, %v385_v56 }
  0xd2   :  { %v475_v62 = vpop.f32.mrf.mxu0  ;;  %vm227_vm3 = vcmp.gt.f32.partialorder %v1580_v55, 20.0 }
  0xd3   :  { %1278 = vpow2.f32 %v195_v58  ;;  %v193_v63 = vmul.f32 1.442695, %v187_v59  ;;  %v495_v0 = vmin.f32 %v1583_v60, 20.0  ;;  %v1586_v1 = vadd.f32 %v475_v62, %v380_v61 }
  0xd4   :  { %v1211_v2 = vpop.f32.mrf.mxu0  ;;  %vm535_vm8 = vcmp.gt.f32.partialorder %v1583_v60, 20.0 }
  0xd5   :  { %1280 = vpow2.f32 %v193_v63  ;;  %v500_v3 = vmul.f32 1.442695, %v495_v0  ;;  %v494_v4 = vmin.f32 %v1586_v1, 20.0  ;;  %v1589_v5 = vadd.f32 %v1211_v2, %v395_v43 }
  0xd6   :  { %v485_v6 = vpop.f32.mrf.mxu0  ;;  %vm534_vm9 = vcmp.gt.f32.partialorder %v1586_v1, 20.0 }
  0xd7   :  { %1282 = vpow2.f32 %v500_v3  ;;  %v498_v7 = vmul.f32 1.442695, %v494_v4  ;;  %v497_v8 = vmin.f32 %v1589_v5, 20.0  ;;  %v1592_v9 = vadd.f32 %v485_v6, %v390_v47 }
  0xd8   :  { %vm537_vm6 = vcmp.gt.f32.partialorder %v1589_v5, 20.0 }
  0xd9   :  { %1284 = vpow2.f32 %v498_v7  ;;  %v504_v10 = vmul.f32 1.442695, %v497_v8  ;;  %v496_v11 = vmin.f32 %v1592_v9, 20.0  ;;  %vm536_vm7 = vcmp.gt.f32.partialorder %v1592_v9, 20.0 }
  0xdb   :  { %1286 = vpow2.f32 %v504_v10  ;;  %v502_v12 = vmul.f32 1.442695, %v496_v11 }
  0xdc   :  { %v1275_v13 = vpop.eup %1274 }
  0xdd   :  { %1288 = vpow2.f32 %v502_v12  ;;  %v198_v14 = vadd.f32 2.0, %v1275_v13 }
  0xde   :  { %v1277_v15 = vpop.eup %1276 }
  0xdf   :  { %v202_v16 = vmul.f32 %v1275_v13, %v198_v14  ;;  %v197_v17 = vadd.f32 2.0, %v1277_v15 }
  0xe0   :  { %v1279_v18 = vpop.eup %1278 }
  0xe1   :  { %v200_v19 = vadd.f32 2.0, %v1279_v18  ;;  %v206_v20 = vadd.f32 2.0, %v202_v16  ;;  %v201_v21 = vmul.f32 %v1277_v15, %v197_v17 }
  0xe2   :  { %v1281_v22 = vpop.eup %1280 }
  0xe3   :  { %v204_v23 = vmul.f32 %v1279_v18, %v200_v19  ;;  %v199_v24 = vadd.f32 2.0, %v1281_v22  ;;  %1290 = vrcp.f32 %v206_v20  ;;  %v205_v25 = vadd.f32 2.0, %v201_v21 }
  0xe4   :  { %v1283_v26 = vpop.eup %1282 }
  0xe5   :  { %v208_v27 = vadd.f32 2.0, %v204_v23  ;;  %v203_v28 = vmul.f32 %v1281_v22, %v199_v24  ;;  %1292 = vrcp.f32 %v205_v25  ;;  %v507_v29 = vadd.f32 2.0, %v1283_v26 }
  0xe6   :  { %v1285_v30 = vpop.eup %1284 }
  0xe7   :  { %1294 = vrcp.f32 %v208_v27  ;;  %v207_v31 = vadd.f32 2.0, %v203_v28  ;;  %v1595_v32 = vmul.f32 %v1283_v26, %v507_v29  ;;  %v506_v33 = vadd.f32 2.0, %v1285_v30 }
  0xe8   :  { %v1287_v34 = vpop.eup %1286 }
  0xe9   :  { %1296 = vrcp.f32 %v207_v31  ;;  %v509_v35 = vadd.f32 2.0, %v1287_v34  ;;  %v515_v36 = vadd.f32 2.0, %v1595_v32  ;;  %v1598_v37 = vmul.f32 %v1285_v30, %v506_v33 }
  0xea   :  { %v1289_v38 = vpop.eup %1288 }
  0xeb   :  { %v513_v39 = vmul.f32 %v1287_v34, %v509_v35  ;;  %v508_v40 = vadd.f32 2.0, %v1289_v38  ;;  %1298 = vrcp.f32 %v515_v36  ;;  %v514_v41 = vadd.f32 2.0, %v1598_v37 }
  0xed   :  { %v517_v43 = vadd.f32 2.0, %v513_v39  ;;  %v1601_v44 = vmul.f32 %v1289_v38, %v508_v40  ;;  %1300 = vrcp.f32 %v514_v41  ;;  %v244_v40 = vld [vmem:[%s1727_s5 + $0x18] sm:$0xff] }
  0xef   :  { %1302 = vrcp.f32 %v517_v43  ;;  %v516_v45 = vadd.f32 2.0, %v1601_v44 }
  0xf0   :  { %v1291_v47 = vpop.eup %1290 }
  0xf1   :  { %v214_v48 = vmul.f32 %v1291_v47, %v206_v20  ;;  %1304 = vrcp.f32 %v516_v45 }
  0xf2   :  { %v1293_v49 = vpop.eup %1292 }
  0xf3   :  { %v218_v50 = vsub.f32 2.0, %v214_v48  ;;  %v213_v52 = vmul.f32 %v1293_v49, %v205_v25 }
  0xf4   :  { %v1295_v53 = vpop.eup %1294 }
  0xf5   :  { %v216_v54 = vmul.f32 %v1295_v53, %v208_v27  ;;  %v217_v56 = vsub.f32 2.0, %v213_v52  ;;  %v222_v58 = vmul.f32 %v1291_v47, %v218_v50 }
  0xf6   :  { %v1297_v57 = vpop.eup %1296 }
  0xf7   :  { %v220_v59 = vsub.f32 2.0, %v216_v54  ;;  %v215_v61 = vmul.f32 %v1297_v57, %v207_v31  ;;  %v221_v63 = vmul.f32 %v1293_v49, %v217_v56  ;;  %v230_v4 = vmul.f32 %v222_v58, %v202_v16 }
  0xf8   :  { %v1299_v62 = vpop.eup %1298 }
  0xf9   :  { %v224_v0 = vmul.f32 %v1295_v53, %v220_v59  ;;  %v219_v2 = vsub.f32 2.0, %v215_v61  ;;  %v523_v6 = vmul.f32 %v1299_v62, %v515_v36  ;;  %v229_v11 = vmul.f32 %v221_v63, %v201_v21 }
  0xfa   :  { %v1301_v3 = vpop.eup %1300  ;;  %v234_v19 = vmul.f32 %v230_v4, %v1571_v42  ;;  %v647_v4 = vld [vmem:[%s1733_s11 + $0x8] sm:$0xff] }
  0xfb   :  { %v232_v7 = vmul.f32 %v224_v0, %v204_v23  ;;  %v223_v8 = vmul.f32 %v1297_v57, %v219_v2  ;;  %v527_v12 = vsub.f32 2.0, %v523_v6  ;;  %v522_v13 = vmul.f32 %v1301_v3, %v514_v41  ;;  %v550_v41 = vld [vmem:[%s1731_s9] sm:$0xff]  ;;  %v648_v6 = vld [vmem:[%s1733_s11 + $0x10] sm:$0xff] }
  0xfc   :  { %v1303_v10 = vpop.eup %1302  ;;  %v233_v21 = vmul.f32 %v229_v11, %v1574_v46 }
  0xfd   :  { %v236_v14 = vmul.f32 %v232_v7, %v1577_v51  ;;  %v231_v15 = vmul.f32 %v223_v8, %v203_v28  ;;  %v525_v17 = vmul.f32 %v1303_v10, %v517_v43  ;;  %v531_v20 = vmul.f32 %v1299_v62, %v527_v12  ;;  %v649_v7 = vld [vmem:[%s1733_s11 + $0x18] sm:$0xff]  ;;  %v828_v8 = vld [vmem:[%s1735_s13] sm:$0xff] }
  0xfe   :  { %v1305_v18 = vpop.eup %1304  ;;  %v526_v22 = vsub.f32 2.0, %v522_v13  ;;  %v237_v34 = vsel %vm225_vm5, %v1574_v46, %v233_v21  ;;  %vm1089_vm5 = vcmask 64512  }
  0xff   :  { %v240_v16 = vsel %vm228_vm2, %v1577_v51, %v236_v14  ;;  %v235_v23 = vmul.f32 %v231_v15, %v1580_v55  ;;  %v529_v24 = vsub.f32 2.0, %v525_v17  ;;  %v524_v25 = vmul.f32 %v1305_v18, %v516_v45  ;;  %v267_v45 = vpop.permute.xlu0 %266 }
 0x100   :  { %1188 = vmatprep.subr.mxu1 %v240_v16  ;;  %v530_v29 = vmul.f32 %v1301_v3, %v526_v22  ;;  %v238_v51 = vsel %vm226_vm4, %v1571_v42, %v234_v19  ;;  %v539_v33 = vmul.f32 %v531_v20, %v1595_v32  ;;  %v243_v32 = vld [vmem:[%s1727_s5 + $0x10] sm:$0xff]  ;;  %v645_v3 = vld [vmem:[%s1744_s29] sm:$0xff] }
 0x101   :  { %1189 = vmatpush3.msra.mxu1 %v240_v16  ;;  %v239_v26 = vsel %vm227_vm3, %v1580_v55, %v235_v23  ;;  %v533_v27 = vmul.f32 %v1303_v10, %v529_v24  ;;  %v528_v28 = vsub.f32 2.0, %v524_v25  ;;  %v242_v55 = vld [vmem:[%s1727_s5 + $0x8] sm:$0xff] }
 0x102   :  { %1190 = vmatprep.subr.mxu1 %v239_v26  ;;  %v538_v42 = vmul.f32 %v530_v29, %v1598_v37 }
 0x103   :  { %1191 = vmatpush3.msra.mxu1 %v239_v26  ;;  %v541_v30 = vmul.f32 %v533_v27, %v513_v39  ;;  %v532_v31 = vmul.f32 %v1305_v18, %v528_v28  ;;  %v543_v39 = vmul.f32 %v539_v33, %v1583_v60  ;;  %v257_v52 = vpop.permute.xlu0 %256 }
 0x104   :  { %1192 = vmatprep.subr.mxu1 %v238_v51 }
 0x105   :  { %1193 = vmatpush3.msra.mxu1 %v238_v51  ;;  %v545_v35 = vmul.f32 %v541_v30, %v1589_v5  ;;  %v540_v36 = vmul.f32 %v532_v31, %v1601_v44  ;;  %v547_v43 = vsel %vm535_vm8, %v1583_v60, %v543_v39  ;;  %v551_v44 = vld [vmem:[%s1731_s9 + $0x8] sm:$0xff]  ;;  %v646_v60 = vld [vmem:[%s1733_s11] sm:$0xff] }
 0x106   :  { %1194 = vmatprep.subr.mxu1 %v237_v34  ;;  %1237 = vmatprep.mubr.msk.f32.mxu0 %vm674_vm10, %v646_v60 }
 0x107   :  { %1195 = vmatpush3.msra.mxu1 %v237_v34  ;;  %v549_v46 = vsel %vm537_vm6, %v1589_v5, %v545_v35  ;;  %v544_v38 = vmul.f32 %v540_v36, %v1592_v9  ;;  %v542_v5 = vmul.f32 %v538_v42, %v1586_v1  ;;  %v562_v61 = vpop.permute.xlu0 %561 }
 0x108   :  { %1197 = vmatmul.mubr.msk.f32.vlgmr.msra.gmra.mxu1 %vm269_vm1, %v242_v55  ;;  %1212 = vmatprep.subr.mxu1 %v549_v46 }
 0x109   :  { %1213 = vmatpush3.msra.mxu1 %v549_v46  ;;  %v548_v37 = vsel %vm536_vm7, %v1592_v9, %v544_v38  ;;  %1199 = vmatprep.mubr.msk.f32.mxu1 %vm269_vm1, %v243_v32  ;;  %v546_v9 = vsel %vm534_vm9, %v1586_v1, %v542_v5  ;;  %v262_v1 = vpop.permute.xlu1 %261 }
 0x10a   :  { %1214 = vmatprep.subr.mxu1 %v548_v37 }
 0x10b   :  { %1215 = vmatpush3.msra.mxu1 %v548_v37  ;;  %v672_v10 = vpop.permute.xlu0 %671 }
 0x10c   :  { %1200 = vmatmul.mubr.msk.f32.gmra.mxu1 %vm269_vm1, %v244_v40  ;;  %1216 = vmatprep.subr.mxu1 %v547_v43 }
 0x10d   :  { %1217 = vmatpush3.msra.mxu1 %v547_v43  ;;  %1220 = vmatprep.mubr.msk.f32.mxu1 %vm269_vm1, %v550_v41  ;;  %v252_v56 = vpop.permute.xlu1 %251 }
 0x10e   :  { %1218 = vmatprep.subr.mxu1 %v546_v9 }
 0x10f   :  { %1219 = vmatpush3.msra.mxu1 %v546_v9  ;;  %v662_v12 = vpop.permute.xlu0 %661 }
 0x110   :  { %1221 = vmatmul.mubr.msk.f32.vlgmr.msra.gmra.mxu1 %vm269_vm1, %v551_v44 }
 0x111   :  { %v557_v0 = vpop.permute.xlu1 %556  ;;  %1251 = vmatprep.mubr.msk.f32.mxu1 %vm269_vm1, %v828_v8 }
 0x115   :  { %v667_v11 = vpop.permute.xlu1 %666 }
 0x119   :  { %v657_v15 = vpop.permute.xlu1 %656 }
 0x1c8   :  { %v1198_v47 = vpop.f32.mrf.mxu1 }
 0x1c9   :  { %v354_v58 = vadd.f32 %v1198_v47, %v257_v52 }
 0x1ca   :  { %v348_v48 = vpop.f32.mrf.mxu1 }
 0x1cb   :  { %v349_v59 = vadd.f32 %v348_v48, %v252_v56 }
 0x1cc   :  { %v1201_v49 = vpop.f32.mrf.mxu1 }
 0x1cd   :  { %v364_v50 = vadd.f32 %v1201_v49, %v267_v45 }
 0x1ce   :  { %v358_v53 = vpop.f32.mrf.mxu1 }
 0x1cf   :  { %v359_v54 = vadd.f32 %v358_v53, %v262_v1  ;;  %1223 = vmatprep.subr.mxu0 %v364_v50 }
 0x1d0   :  { %v1222_v57 = vpop.f32.mrf.mxu1  ;;  %1224 = vmatpush3.msra.mxu0 %v364_v50 }
 0x1d1   :  { %1225 = vmatprep.subr.mxu0 %v359_v54  ;;  %v642_v63 = vadd.f32 %v1222_v57, %v562_v61 }
 0x1d2   :  { %1226 = vmatpush3.msra.mxu0 %v359_v54  ;;  %v636_v62 = vpop.f32.mrf.mxu1 }
 0x1d3   :  { %1227 = vmatprep.subr.mxu0 %v354_v58  ;;  %v637_v2 = vadd.f32 %v636_v62, %v557_v0 }
 0x1d4   :  { %1228 = vmatpush3.msra.mxu0 %v354_v58 }
 0x1d5   :  { %1229 = vmatprep.subr.mxu0 %v349_v59 }
 0x1d6   :  { %1230 = vmatpush3.msra.mxu0 %v349_v59 }
 0x1d7   :  { %1231 = vmatprep.subr.mxu0 %v642_v63 }
 0x1d8   :  { %1232 = vmatpush3.msra.mxu0 %v642_v63 }
 0x1d9   :  { %1233 = vmatprep.subr.mxu0 %v637_v2 }
 0x1da   :  { %1234 = vmatpush3.msra.mxu0 %v637_v2 }
 0x1db   :  { %1235 = vmatprep.subr.mxu0 %v645_v3 }
 0x1dc   :  { %1236 = vmatpush3.msra.mxu0 %v645_v3 }
 0x1dd   :  { %1238 = vmatmul.mubr.msk.f32.vlgmr.msra.gmra.mxu0 %vm674_vm10, %v647_v4 }
 0x1de   :  { %1240 = vmatprep.mubr.msk.f32.mxu0 %vm674_vm10, %v648_v6 }
 0x1e1   :  { %1241 = vmatmul.mubr.msk.f32.gmra.mxu0 %vm674_vm10, %v649_v7 }
 0x29d   :  { %v1239_v13 = vpop.f32.mrf.mxu0 }
 0x29e   :  { %v1674_v14 = vadd.f32 %v1239_v13, %v662_v12  ;;  %v831_v12 = vld [vmem:[%s1735_s13 + $0x18] sm:$0xff]  ;;  %v1361_v13 = vmov 0.0  }
 0x29f   :  { %v753_v17 = vpop.f32.mrf.mxu0 }
 0x2a0   :  { %v773_v18 = vmin.f32 %v1674_v14, 20.0  ;;  %v1677_v19 = vadd.f32 %v753_v17, %v657_v15  ;;  %vm813_vm13 = vcmp.gt.f32.partialorder %v1674_v14, 20.0  ;;  %v849_v15 = vpop.permute.xlu1 %848 }
 0x2a1   :  { %v1242_v20 = vpop.f32.mrf.mxu0 }
 0x2a2   :  { %v778_v22 = vmul.f32 1.442695, %v773_v18  ;;  %v772_v16 = vmin.f32 %v1677_v19, 20.0  ;;  %v769_v23 = vadd.f32 %v1242_v20, %v672_v10  ;;  %vm812_vm14 = vcmp.gt.f32.partialorder %v1677_v19, 20.0  ;;  %v829_v10 = vld [vmem:[%s1735_s13 + $0x8] sm:$0xff] }
 0x2a3   :  { %v763_v24 = vpop.f32.mrf.mxu0 }
 0x2a4   :  { %1306 = vpow2.f32 %v778_v22  ;;  %v776_v25 = vmul.f32 1.442695, %v772_v16  ;;  %v775_v21 = vmin.f32 %v769_v23, 20.0  ;;  %v764_v26 = vadd.f32 %v763_v24, %v667_v11  ;;  %v830_v11 = vld [vmem:[%s1735_s13 + $0x10] sm:$0xff]  ;;  %v839_v20 = vpop.permute.xlu1 %838 }
 0x2a5   :  { %vm815_vm11 = vcmp.gt.f32.partialorder %v769_v23, 20.0 }
 0x2a6   :  { %1308 = vpow2.f32 %v776_v25  ;;  %v782_v27 = vmul.f32 1.442695, %v775_v21  ;;  %v774_v28 = vmin.f32 %v764_v26, 20.0  ;;  %vm814_vm12 = vcmp.gt.f32.partialorder %v764_v26, 20.0 }
 0x2a8   :  { %1310 = vpow2.f32 %v782_v27  ;;  %v780_v29 = vmul.f32 1.442695, %v774_v28 }
 0x2aa   :  { %1312 = vpow2.f32 %v780_v29 }
 0x2b1   :  { %v1307_v51 = vpop.eup %1306 }
 0x2b2   :  { %v785_v30 = vadd.f32 2.0, %v1307_v51 }
 0x2b3   :  { %v1309_v31 = vpop.eup %1308 }
 0x2b4   :  { %v789_v33 = vmul.f32 %v1307_v51, %v785_v30  ;;  %v784_v34 = vadd.f32 2.0, %v1309_v31 }
 0x2b5   :  { %v1311_v55 = vpop.eup %1310 }
 0x2b6   :  { %v787_v35 = vadd.f32 2.0, %v1311_v55  ;;  %v793_v36 = vadd.f32 2.0, %v789_v33  ;;  %v788_v42 = vmul.f32 %v1309_v31, %v784_v34 }
 0x2b7   :  { %v1313_v32 = vpop.eup %1312 }
 0x2b8   :  { %v791_v46 = vmul.f32 %v1311_v55, %v787_v35  ;;  %v786_v38 = vadd.f32 2.0, %v1313_v32  ;;  %1314 = vrcp.f32 %v793_v36  ;;  %v792_v39 = vadd.f32 2.0, %v788_v42 }
 0x2ba   :  { %v795_v37 = vadd.f32 2.0, %v791_v46  ;;  %v790_v40 = vmul.f32 %v1313_v32, %v786_v38  ;;  %1316 = vrcp.f32 %v792_v39 }
 0x2bc   :  { %1318 = vrcp.f32 %v795_v37  ;;  %v794_v5 = vadd.f32 2.0, %v790_v40 }
 0x2be   :  { %1320 = vrcp.f32 %v794_v5 }
 0x2c5   :  { %v1315_v41 = vpop.eup %1314 }
 0x2c6   :  { %v801_v43 = vmul.f32 %v1315_v41, %v793_v36 }
 0x2c7   :  { %v1317_v9 = vpop.eup %1316 }
 0x2c8   :  { %v805_v44 = vsub.f32 2.0, %v801_v43  ;;  %v800_v60 = vmul.f32 %v1317_v9, %v792_v39 }
 0x2c9   :  { %v1319_v45 = vpop.eup %1318 }
 0x2ca   :  { %v803_v47 = vmul.f32 %v1319_v45, %v795_v37  ;;  %v804_v1 = vsub.f32 2.0, %v800_v60  ;;  %v809_v52 = vmul.f32 %v1315_v41, %v805_v44 }
 0x2cb   :  { %v1321_v48 = vpop.eup %1320 }
 0x2cc   :  { %v807_v49 = vsub.f32 2.0, %v803_v47  ;;  %v802_v50 = vmul.f32 %v1321_v48, %v794_v5  ;;  %v808_v56 = vmul.f32 %v1317_v9, %v804_v1  ;;  %v817_v59 = vmul.f32 %v809_v52, %v789_v33 }
 0x2ce   :  { %v811_v53 = vmul.f32 %v1319_v45, %v807_v49  ;;  %v806_v54 = vsub.f32 2.0, %v802_v50  ;;  %v816_v63 = vmul.f32 %v808_v56, %v788_v42  ;;  %v821_v3 = vmul.f32 %v817_v59, %v1674_v14 }
 0x2d0   :  { %v819_v57 = vmul.f32 %v811_v53, %v791_v46  ;;  %v810_v58 = vmul.f32 %v1321_v48, %v806_v54  ;;  %v820_v6 = vmul.f32 %v816_v63, %v1677_v19  ;;  %v825_v7 = vsel %vm813_vm13, %v1674_v14, %v821_v3  ;;  %v854_v14 = vpop.permute.xlu0 %853 }
 0x2d2   :  { %v823_v61 = vmul.f32 %v819_v57, %v769_v23  ;;  %v818_v62 = vmul.f32 %v810_v58, %v790_v40  ;;  %v824_v8 = vsel %vm812_vm14, %v1677_v19, %v820_v6 }
 0x2d4   :  { %v827_v0 = vsel %vm815_vm11, %v769_v23, %v823_v61  ;;  %v822_v2 = vmul.f32 %v818_v62, %v764_v26  ;;  %v844_v17 = vpop.permute.xlu0 %843 }
 0x2d5   :  { %1243 = vmatprep.subr.mxu1 %v827_v0 }
 0x2d6   :  { %1244 = vmatpush3.msra.mxu1 %v827_v0  ;;  %v826_v4 = vsel %vm814_vm12, %v764_v26, %v822_v2 }
 0x2d7   :  { %1245 = vmatprep.subr.mxu1 %v826_v4 }
 0x2d8   :  { %1246 = vmatpush3.msra.mxu1 %v826_v4 }
 0x2d9   :  { %1247 = vmatprep.subr.mxu1 %v825_v7 }
 0x2da   :  { %1248 = vmatpush3.msra.mxu1 %v825_v7 }
 0x2db   :  { %1249 = vmatprep.subr.mxu1 %v824_v8 }
 0x2dc   :  { %1250 = vmatpush3.msra.mxu1 %v824_v8 }
 0x2dd   :  { %1252 = vmatmul.mubr.msk.f32.vlgmr.msra.gmra.mxu1 %vm269_vm1, %v829_v10  ;;  %1257 = vmatprep.subr.mxu1 %v1361_v13 }
 0x2de   :  { %1254 = vmatprep.mubr.msk.f32.mxu1 %vm269_vm1, %v830_v11 }
 0x2e1   :  { %1255 = vmatmul.mubr.msk.f32.gmra.mxu1 %vm269_vm1, %v831_v12 }
 0x2e2   :  { %1265 = vmatprep.mubr.msk.f32.mxu1 %vm1362_vm15, %v1361_v13 }
 0x39d   :  { %v1253_v18 = vpop.f32.mrf.mxu1 }
 0x39e   :  { %v1700_v19 = vadd.f32 %v1253_v18, %v844_v17  ;;  %v1014_v17 = vpop.permute.xlu0 %1013 }
 0x39f   :  { %v934_v22 = vpop.f32.mrf.mxu1 }
 0x3a0   :  { %v954_v16 = vmin.f32 %v1700_v19, 20.0  ;;  %v1703_v23 = vadd.f32 %v934_v22, %v839_v20  ;;  %vm994_vm3 = vcmp.gt.f32.partialorder %v1700_v19, 20.0 }
 0x3a1   :  { %v1256_v24 = vpop.f32.mrf.mxu1 }
 0x3a2   :  { %v959_v25 = vmul.f32 1.442695, %v954_v16  ;;  %v953_v21 = vmin.f32 %v1703_v23, 20.0  ;;  %v950_v26 = vadd.f32 %v1256_v24, %v854_v14  ;;  %vm993_vm4 = vcmp.gt.f32.partialorder %v1703_v23, 20.0  ;;  %v1009_v14 = vld [vmem:[%s1737_s15] sm:$0xff] }
 0x3a3   :  { %v944_v27 = vpop.f32.mrf.mxu1 }
 0x3a4   :  { %1322 = vpow2.f32 %v959_v25  ;;  %v957_v28 = vmul.f32 1.442695, %v953_v21  ;;  %v956_v29 = vmin.f32 %v950_v26, 20.0  ;;  %v945_v51 = vadd.f32 %v944_v27, %v849_v15 }
 0x3a5   :  { %vm996_vm0 = vcmp.gt.f32.partialorder %v950_v26, 20.0 }
 0x3a6   :  { %1324 = vpow2.f32 %v957_v28  ;;  %v963_v30 = vmul.f32 1.442695, %v956_v29  ;;  %v955_v31 = vmin.f32 %v945_v51, 20.0  ;;  %vm995_vm2 = vcmp.gt.f32.partialorder %v945_v51, 20.0 }
 0x3a8   :  { %1326 = vpow2.f32 %v963_v30  ;;  %v961_v33 = vmul.f32 1.442695, %v955_v31 }
 0x3aa   :  { %1328 = vpow2.f32 %v961_v33 }
 0x3b1   :  { %v1323_v34 = vpop.eup %1322 }
 0x3b2   :  { %v966_v55 = vadd.f32 2.0, %v1323_v34 }
 0x3b3   :  { %v1325_v35 = vpop.eup %1324 }
 0x3b4   :  { %v970_v36 = vmul.f32 %v1323_v34, %v966_v55  ;;  %v965_v42 = vadd.f32 2.0, %v1325_v35 }
 0x3b5   :  { %v1327_v32 = vpop.eup %1326 }
 0x3b6   :  { %v968_v46 = vadd.f32 2.0, %v1327_v32  ;;  %v974_v38 = vadd.f32 2.0, %v970_v36  ;;  %v969_v39 = vmul.f32 %v1325_v35, %v965_v42 }
 0x3b7   :  { %v1329_v37 = vpop.eup %1328 }
 0x3b8   :  { %v972_v40 = vmul.f32 %v1327_v32, %v968_v46  ;;  %v967_v5 = vadd.f32 2.0, %v1329_v37  ;;  %1330 = vrcp.f32 %v974_v38  ;;  %v973_v41 = vadd.f32 2.0, %v969_v39 }
 0x3ba   :  { %v976_v43 = vadd.f32 2.0, %v972_v40  ;;  %v971_v9 = vmul.f32 %v1329_v37, %v967_v5  ;;  %1332 = vrcp.f32 %v973_v41 }
 0x3bc   :  { %1334 = vrcp.f32 %v976_v43  ;;  %v975_v44 = vadd.f32 2.0, %v971_v9 }
 0x3be   :  { %1336 = vrcp.f32 %v975_v44 }
 0x3c5   :  { %v1331_v60 = vpop.eup %1330 }
 0x3c6   :  { %v982_v45 = vmul.f32 %v1331_v60, %v974_v38 }
 0x3c7   :  { %v1333_v47 = vpop.eup %1332 }
 0x3c8   :  { %v986_v1 = vsub.f32 2.0, %v982_v45  ;;  %v981_v48 = vmul.f32 %v1333_v47, %v973_v41 }
 0x3c9   :  { %v1335_v49 = vpop.eup %1334 }
 0x3ca   :  { %v984_v50 = vmul.f32 %v1335_v49, %v976_v43  ;;  %v985_v52 = vsub.f32 2.0, %v981_v48  ;;  %v990_v57 = vmul.f32 %v1331_v60, %v986_v1 }
 0x3cb   :  { %v1337_v53 = vpop.eup %1336 }
 0x3cc   :  { %v988_v54 = vsub.f32 2.0, %v984_v50  ;;  %v983_v56 = vmul.f32 %v1337_v53, %v975_v44  ;;  %v989_v61 = vmul.f32 %v1333_v47, %v985_v52  ;;  %v998_v0 = vmul.f32 %v990_v57, %v970_v36 }
 0x3ce   :  { %v992_v58 = vmul.f32 %v1335_v49, %v988_v54  ;;  %v987_v59 = vsub.f32 2.0, %v983_v56  ;;  %v997_v4 = vmul.f32 %v989_v61, %v969_v39  ;;  %v1002_v8 = vmul.f32 %v998_v0, %v1700_v19 }
 0x3d0   :  { %v1000_v62 = vmul.f32 %v992_v58, %v972_v40  ;;  %v991_v63 = vmul.f32 %v1337_v53, %v987_v59  ;;  %v1001_v11 = vmul.f32 %v997_v4, %v1703_v23  ;;  %v1006_v12 = vsel %vm994_vm3, %v1700_v19, %v1002_v8 }
 0x3d2   :  { %v1004_v2 = vmul.f32 %v1000_v62, %v950_v26  ;;  %v999_v3 = vmul.f32 %v991_v63, %v971_v9  ;;  %v1005_v15 = vsel %vm993_vm4, %v1703_v23, %v1001_v11 }
 0x3d4   :  { %v1008_v6 = vsel %vm996_vm0, %v950_v26, %v1004_v2  ;;  %v1003_v7 = vmul.f32 %v999_v3, %v945_v51 }
 0x3d5   :  { %1258 = vmatpush3.msra.mxu1 %v1008_v6 }
 0x3d6   :  { %1259 = vmatprep.subr.mxu1 %v1361_v13  ;;  %v1007_v10 = vsel %vm995_vm2, %v945_v51, %v1003_v7 }
 0x3d7   :  { %1260 = vmatpush3.msra.mxu1 %v1007_v10 }
 0x3d8   :  { %1261 = vmatprep.subr.mxu1 %v1361_v13 }
 0x3d9   :  { %1262 = vmatpush3.msra.mxu1 %v1006_v12 }
 0x3da   :  { %1263 = vmatprep.subr.mxu1 %v1361_v13 }
 0x3db   :  { %1264 = vmatpush3.msra.mxu1 %v1005_v15 }
 0x3dc   :  { %1266 = vmatmul.mubr.msk.f32.vlgmr.msra.gmra.mxu1 %vm269_vm1, %v1009_v14 }
 0x49c   :  { %v1085_v18 = vpop.f32.mrf.mxu1 }
 0x49d   :  { %v1086_v19 = vadd.f32 %v1085_v18, %v1014_v17 }
 0x49e   :  { %v1267_v20 = vpop.f32.mrf.mxu1 }
 0x49f   :  { %1090 = vst.msk [vmem:[#allocation2] sm:$0xff] %vm1089_vm5, %v1086_v19 }
 0x4a0   :  { %1349 = shalt.err (!%p1346_p4)
}
 0x4a1   :  { %1100 = dma.vmem_to_hbm [thread:$0]  %s1098_s22, 128, %s1739_s17, [#allocation3]  }
 0x4a2   :  { %1358 = dma.done.wait [#allocation3], 128  }
 0x4a3   :  { %1359 = vsyncadd [#allocation3], 4294967168 }
 0x4a4   :  { %1104 = vsyncpa [#allocation3], 1 }

</bundles_post_ra>
